<compile_context>
chip_gen: v6e
topology: v6e:2x2x1
jax: 0.10.0
libtpu: 0.0.40
codegen_flags: <defaults>
</compile_context>

<pallas_src>
import functools

import jax
import jax.numpy as jnp
from jax.experimental import pallas as pl
from jax.experimental.pallas import tpu as pltpu

_LANE = 128
_MAX_TILE_ROWS = 1024  # (1024, 128) f32 block = 512 KiB per input


def _round_up(x, m):
    return ((x + m - 1) // m) * m


def _mse_kernel(p_ref, t_ref, o_ref, acc_ref, *, tile_rows, total_rows, scale):
    i = pl.program_id(0)
    last = pl.num_programs(0) - 1

    @pl.when(i == 0)
    def _init():
        acc_ref[...] = jnp.zeros_like(acc_ref)

    def _accumulate(apply_mask):
        d = p_ref[...] - t_ref[...]
        sq = d * d
        if apply_mask:
            row_ids = i * tile_rows + jax.lax.broadcasted_iota(
                jnp.int32, (tile_rows, _LANE), 0
            )
            sq = jnp.where(row_ids < total_rows, sq, jnp.float32(0.0))
        # Fold (tile_rows, 128) -> (8, 128): reduce only the leading axis so
        # the running sum stays a plain VPU add chain on one vreg.
        acc_ref[...] += sq.reshape(tile_rows // 8, 8, _LANE).sum(axis=0)

    if total_rows % tile_rows != 0:  # static: a ragged last block exists
        @pl.when(i != last)
        def _full():
            _accumulate(apply_mask=False)

        @pl.when(i == last)
        def _tail():
            _accumulate(apply_mask=True)
    else:
        _accumulate(apply_mask=False)

    @pl.when(i == last)
    def _finalize():
        o_ref[0, 0] = jnp.sum(acc_ref[...]) * jnp.float32(scale)


_BITCAST_PAIRS_OK = None


def _as_float_pairs(x):
    """complex64 -> f32 with trailing (real, imag) axis of size 2.

    Uses a zero-copy bitcast when supported (saves a full HBM pass per input);
    otherwise falls back to the copying real/imag stack.  Pair order is
    irrelevant for a sum of squared differences.
    """
    global _BITCAST_PAIRS_OK
    x = x.astype(jnp.complex64)
    if _BITCAST_PAIRS_OK is None:
        try:
            probe = jax.lax.bitcast_convert_type(
                jnp.zeros((1,), jnp.complex64), jnp.float32
            )
            jax.block_until_ready(probe)
            _BITCAST_PAIRS_OK = probe.shape == (1, 2)
        except Exception:
            _BITCAST_PAIRS_OK = False
    if _BITCAST_PAIRS_OK:
        return jax.lax.bitcast_convert_type(x, jnp.float32)
    return jnp.stack([jnp.real(x), jnp.imag(x)], axis=-1).astype(jnp.float32)


def mse_loss_pallas(pred, target, loss_weight=1.0):
    """pred, target: complex arrays of identical shape. Returns scalar f32.

    loss_weight must be a static Python number.
    """
    pred = jnp.asarray(pred)
    target = jnp.asarray(target)
    assert pred.shape == target.shape, (pred.shape, target.shape)

    pf = _as_float_pairs(pred)
    tf = _as_float_pairs(target)

    n_true = pf.size  # true element count of the stacked (real, imag) tensor
    if n_true == 0:
        # torch.mean of an empty tensor is NaN; avoid an empty grid / div-0.
        return jnp.float32(jnp.nan)

    flat_p = pf.reshape(-1)
    flat_t = tf.reshape(-1)

    # Pad only up to the next lane boundary (<= 127 elems, rare) so the flat
    # vector reshapes to a lane-dense (rows, 128) slab.  Padded diffs are zero
    # and we divide by the true count, so the result is unchanged.
    pad = (-n_true) % _LANE
    if pad:
        flat_p = jnp.pad(flat_p, (0, pad))
        flat_t = jnp.pad(flat_t, (0, pad))

    rows = flat_p.size // _LANE
    p2 = flat_p.reshape(rows, _LANE)
    t2 = flat_t.reshape(rows, _LANE)

    # Biggest tile that fits comfortably in VMEM; always a multiple of 8 rows.
    tile_rows = min(_MAX_TILE_ROWS, _round_up(rows, 8))
    grid = (pl.cdiv(rows, tile_rows),)

    kernel = functools.partial(
        _mse_kernel,
        tile_rows=tile_rows,
        total_rows=rows,
        scale=float(loss_weight) / float(n_true),
    )

    # TODO(synk): on v7x (2 TensorCores) a leading parallel grid axis with
    # per-core partial outputs would ~2x this bandwidth-bound reduction.
    out = pl.pallas_call(
        kernel,
        out_shape=jax.ShapeDtypeStruct((1, 1), jnp.float32),
        grid_spec=pltpu.PrefetchScalarGridSpec(
            num_scalar_prefetch=0,
            grid=grid,
            in_specs=[
                pl.BlockSpec((tile_rows, _LANE), lambda i: (i, 0)),
                pl.BlockSpec((tile_rows, _LANE), lambda i: (i, 0)),
            ],
            out_specs=pl.BlockSpec(memory_space=pltpu.MemorySpace.SMEM),
            scratch_shapes=[pltpu.VMEM((8, _LANE), jnp.float32)],
        ),
        compiler_params=pltpu.CompilerParams(
            dimension_semantics=("arbitrary",)
        ),
    )(p2, t2)
    return out[0, 0]


if __name__ == "__main__":
    key = jax.random.PRNGKey(0)

    def _rand_complex(k, shape):
        k1, k2 = jax.random.split(k)
        return (
            jax.random.normal(k1, shape, jnp.float32)
            + 1j * jax.random.normal(k2, shape, jnp.float32)
        ).astype(jnp.complex64)

    def _ref(pred, target, w):
        pf = jnp.stack([pred.real, pred.imag], -1)
        tf = jnp.stack([target.real, target.imag], -1)
        return jnp.mean((pf - tf) ** 2) * w

    cases = [
        ((2, 4, 16, 16), 1.0),  # aligned: single full tile
        ((2, 3, 17, 9), 0.5),   # ragged: lane pad + masked partial block
        ((2, 4, 96, 96), 2.0),  # multi-tile grid with masked last block
    ]
    keys = jax.random.split(key, 2 * len(cases))
    for idx, (shape, w) in enumerate(cases):
        pred = _rand_complex(keys[2 * idx], shape)
        target = _rand_complex(keys[2 * idx + 1], shape)
        got = jax.block_until_ready(mse_loss_pallas(pred, target, loss_weight=w))
        want = _ref(pred, target, w)
        assert jnp.allclose(got, want, rtol=1e-5, atol=1e-6), (shape, got, want)

    print("KERNEL_OK")
</pallas_src>

<mosaic_0001>
module attributes {stable_mosaic.version = 11 : i64} {
  func.func @_mse_kernel(%arg0: i32, %arg1: memref<32x128xf32, #tpu.memory_space<vmem>>, %arg2: memref<32x128xf32, #tpu.memory_space<vmem>>, %arg3: memref<1x1xf32, #tpu.memory_space<smem>>, %arg4: memref<8x128xf32, #tpu.memory_space<vmem>>) attributes {dimension_semantics = [#tpu.dimension_semantics<arbitrary>], iteration_bounds = array<i64: 1>, scalar_prefetch = 0 : i64, scratch_operands = 1 : i64, tpu.core_type = #tpu.core_type<tc>, window_params = [{transform_indices = @transform_0, window_bounds = array<i64: 32, 128>}, {transform_indices = @transform_1, window_bounds = array<i64: 32, 128>}, {transform_indices = @transform_2, window_bounds = array<i64: 1, 1>}]} {
    %c0_i32 = arith.constant 0 : i32
    %0 = arith.cmpi eq, %arg0, %c0_i32 : i32
    %1 = arith.extui %0 : i1 to i32
    %c0_i32_0 = arith.constant 0 : i32
    %2 = arith.cmpi ne, %1, %c0_i32_0 : i32
    scf.if %2 {
      %cst_10 = arith.constant 0.000000e+00 : f32
      %15 = vector.broadcast %cst_10 : f32 to vector<8x128xf32>
      %c0_11 = arith.constant 0 : index
      %c0_12 = arith.constant 0 : index
      %16 = vector.load %arg4[%c0_11, %c0_12] : memref<8x128xf32, #tpu.memory_space<vmem>>, vector<8x128xf32>
      tpu.vector_store %arg4[%c0_11, %c0_12], %15 {strides = array<i32>} : memref<8x128xf32, #tpu.memory_space<vmem>>, vector<8x128xf32>,
    } else {
    }
    %c0 = arith.constant 0 : index
    %c0_1 = arith.constant 0 : index
    %3 = vector.load %arg1[%c0, %c0_1] : memref<32x128xf32, #tpu.memory_space<vmem>>, vector<32x128xf32>
    %c0_2 = arith.constant 0 : index
    %c0_3 = arith.constant 0 : index
    %4 = vector.load %arg2[%c0_2, %c0_3] : memref<32x128xf32, #tpu.memory_space<vmem>>, vector<32x128xf32>
    %5 = arith.subf %3, %4 : vector<32x128xf32>
    %6 = arith.mulf %5, %5 : vector<32x128xf32>
    %c0_4 = arith.constant 0 : index
    %c0_5 = arith.constant 0 : index
    %7 = vector.load %arg4[%c0_4, %c0_5] : memref<8x128xf32, #tpu.memory_space<vmem>>, vector<8x128xf32>
    %8 = vector.shape_cast %6 : vector<32x128xf32> to vector<4x8x128xf32>
    %cst = arith.constant dense<0.000000e+00> : vector<8x128xf32>
    %9 = vector.multi_reduction <add>, %8, %cst [0] : vector<4x8x128xf32> to vector<8x128xf32>
    %10 = arith.addf %7, %9 : vector<8x128xf32>
    %c0_6 = arith.constant 0 : index
    %c0_7 = arith.constant 0 : index
    %11 = vector.load %arg4[%c0_6, %c0_7] : memref<8x128xf32, #tpu.memory_space<vmem>>, vector<8x128xf32>
    tpu.vector_store %arg4[%c0_6, %c0_7], %10 {strides = array<i32>} : memref<8x128xf32, #tpu.memory_space<vmem>>, vector<8x128xf32>,
    %c0_i32_8 = arith.constant 0 : i32
    %12 = arith.cmpi eq, %arg0, %c0_i32_8 : i32
    %13 = arith.extui %12 : i1 to i32
    %c0_i32_9 = arith.constant 0 : i32
    %14 = arith.cmpi ne, %13, %c0_i32_9 : i32
    scf.if %14 {
      %c0_10 = arith.constant 0 : index
      %c0_11 = arith.constant 0 : index
      %15 = vector.load %arg4[%c0_10, %c0_11] : memref<8x128xf32, #tpu.memory_space<vmem>>, vector<8x128xf32>
      %16 = vector.shape_cast %15 : vector<8x128xf32> to vector<1x8x128xf32>
      %cst_12 = arith.constant dense<0.000000e+00> : vector<1xf32>
      %17 = vector.multi_reduction <add>, %16, %cst_12 [1, 2] : vector<1x8x128xf32> to vector<1xf32>
      %18 = vector.shape_cast %17 : vector<1xf32> to vector<1x1x1xf32>
      %19 = vector.extract %18[0, 0, 0] : f32 from vector<1x1x1xf32>
      %cst_13 = arith.constant 2.44140625E-4 : f32
      %20 = arith.mulf %19, %cst_13 : f32
      %c0_14 = arith.constant 0 : index
      %c0_15 = arith.constant 0 : index
      %21 = memref.load %arg3[%c0_14, %c0_15] : memref<1x1xf32, #tpu.memory_space<smem>>
      memref.store %20, %arg3[%c0_14, %c0_15] : memref<1x1xf32, #tpu.memory_space<smem>>
    } else {
    }
    return
  }
  func.func @transform_0(%arg0: i32) -> (i32, i32) {
    %c0_i32 = arith.constant 0 : i32
    %c0_i32_0 = arith.constant 0 : i32
    return %arg0, %c0_i32 : i32, i32
  }
  func.func @transform_1(%arg0: i32) -> (i32, i32) {
    %c0_i32 = arith.constant 0 : i32
    %c0_i32_0 = arith.constant 0 : i32
    return %arg0, %c0_i32 : i32, i32
  }
  func.func @transform_2(%arg0: i32) -> (i32, i32) {
    %c0_i32 = arith.constant 0 : i32
    %c0_i32_0 = arith.constant 0 : i32
    %c0_i32_1 = arith.constant 0 : i32
    return %c0_i32, %c0_i32_0 : i32, i32
  }
}

</mosaic_0001>

<bundles_post_ra>
// kernel: tpu_custom_call.1
= control target key start
LH: loop header
LB: loop body
LE: loop exit
PB: predicated region body
PF: predicated region fallthrough
CT: control target
= control target key end

     0   :  { %7 = vsyncpa [#allocation4], 0  ;;  %s188_s0 = inlined_call_operand.hbm [shape: f32[32,128], index: 0, kind: input, shape index: {}]   ;;  %s189_s1 = inlined_call_operand.hbm [shape: f32[32,128], index: 1, kind: input, shape index: {}]   ;;  %s190_s2 = inlined_call_operand.hbm [shape: f32[1,1], index: 2, kind: output, shape index: {}]  }
   0x1   :  { %8 = vsyncpa [#allocation7], 0 }
   0x2   :  { %9 = vsyncpa [#allocation5], 0  ;;  %s159_s9 = smov [#allocation3]  }
   0x3   :  { %s15_s10 = sshll.u32 %s159_s9, 4  ;;  %s16_s10 = int_to_ptr.vmem [resolvable:$true] %s15_s10 }
   0x4   :  { %s113_s11 = scalar_lea.vmem %s16_s10, 512  ;;  %p118_p1 = scmp.lt.s32.totalorder %s16_s10, %s16_s10 }
   0x5   :  { %p114_p0 = scmp.ne.s32.totalorder %s16_s10, %s113_s11  ;;  %p119_p2 = scmp.lt.s32.totalorder %s113_s11, %s113_s11 }
   0x7   :  { %p120_p3 = por %p119_p2, %p118_p1 }
   0x9   :  { %p121_p4 = pnand %p120_p3, %p114_p0 }
   0xb   :  { %124 = shalt.err (!%p121_p4)
}
   0xc   :  { %s160_s12 = smov 128   ;;  %s161_s13 = smov 8  }
   0xd   :  { %21 = dma.hbm_to_vmem [thread:$0]  %s188_s0, 512, %s16_s10, [#allocation4], %s160_s12, %s160_s12, %s161_s13  }
   0xe   :  { %s162_s16 = smov [#allocation6]  }
   0xf   :  { %s27_s17 = sshll.u32 %s162_s16, 4  ;;  %s28_s17 = int_to_ptr.vmem [resolvable:$true] %s27_s17 }
  0x10   :  { %s133_s18 = scalar_lea.vmem %s28_s17, 512  ;;  %p138_p6 = scmp.lt.s32.totalorder %s28_s17, %s28_s17 }
  0x11   :  { %p134_p5 = scmp.ne.s32.totalorder %s28_s17, %s133_s18  ;;  %p139_p7 = scmp.lt.s32.totalorder %s133_s18, %s133_s18 }
  0x13   :  { %p140_p8 = por %p139_p7, %p138_p6 }
  0x15   :  { %p141_p9 = pnand %p140_p8, %p134_p5 }
  0x17   :  { %144 = shalt.err (!%p141_p9)
}
  0x18   :  { %33 = dma.hbm_to_vmem [thread:$0]  %s189_s1, 512, %s28_s17, [#allocation7], %s160_s12, %s160_s12, %s161_s13  }
  0x19   :  { %153 = dma.done.wait [#allocation4], 512  }
  0x1a   :  { %154 = vsyncadd [#allocation4], 4294966784 }
  0x1b   :  { %155 = dma.done.wait [#allocation7], 512  }
  0x1c   :  { %156 = vsyncadd [#allocation7], 4294966784  ;;  %v45_v0 = vld [vmem:[#allocation3] sm:$0xff]  ;;  %v46_v1 = vld [vmem:[#allocation3 + $0x8] sm:$0xff]  ;;  %s163_s21 = smov [#allocation8]  }
  0x1d   :  { %v47_v2 = vld [vmem:[#allocation3 + $0x10] sm:$0xff]  ;;  %v48_v3 = vld [vmem:[#allocation3 + $0x18] sm:$0xff]  ;;  %v49_v4 = vld [vmem:[#allocation6] sm:$0xff] }
  0x1e   :  { %v50_v5 = vld [vmem:[#allocation6 + $0x8] sm:$0xff]  ;;  %v51_v6 = vld [vmem:[#allocation6 + $0x10] sm:$0xff]  ;;  %v52_v7 = vld [vmem:[#allocation6 + $0x18] sm:$0xff]  ;;  %v53_v8 = vsub.f32 %v45_v0, %v49_v4 }
  0x1f   :  { %v54_v9 = vsub.f32 %v46_v1, %v50_v5  ;;  %v55_v10 = vsub.f32 %v47_v2, %v51_v6  ;;  %v56_v11 = vsub.f32 %v48_v3, %v52_v7 }
  0x20   :  { %v57_v12 = vmul.f32 %v53_v8, %v53_v8 }
  0x21   :  { %v58_v13 = vmul.f32 %v54_v9, %v54_v9  ;;  %v59_v14 = vmul.f32 %v55_v10, %v55_v10  ;;  %v60_v15 = vmul.f32 %v56_v11, %v56_v11 }
  0x23   :  { %v62_v16 = vadd.f32 %v58_v13, %v57_v12 }
  0x25   :  { %v63_v17 = vadd.f32 %v62_v16, %v59_v14 }
  0x27   :  { %v64_v18 = vadd.f32 %v63_v17, %v60_v15 }
  0x29   :  { %71 = vadd.xlane.f32.xlu0 %v64_v18 }
  0xb2   :  { %v72_v19 = vpop.xlane.xlu0 %71 }
  0xb3   :  { %v73_v20 = vrot.slane %v72_v19, 4 }
  0xb5   :  { %v74_v21 = vadd.f32 %v73_v20, %v72_v19 }
  0xb7   :  { %v75_v22 = vrot.slane %v74_v21, 2 }
  0xb9   :  { %v76_v23 = vadd.f32 %v75_v22, %v74_v21 }
  0xbb   :  { %v77_v24 = vrot.slane %v76_v23, 1 }
  0xbd   :  { %v78_v25 = vadd.f32 %v77_v24, %v76_v23 }
  0xbf   :  { %98 = vpush %v78_v25 }
  0xf0   :  { %s99_s0 = spop %98 }
  0xf1   :  { %s80_s1 = smul.f32 0.00024414063, %s99_s0 }
  0xf3   :  { %82 = sst [smem:[#allocation8]] %s80_s1 }
  0xf4   :  { %90 = dma.smem_to_hbm %s163_s21, 16, %s190_s2, [#allocation5]  }
  0xf5   :  { %157 = dma.done.wait [#allocation5], 16  }
  0xf6   :  { %158 = vsyncadd [#allocation5], 4294967280 }
  0xf7   :  { %94 = sfence }
  0xf8   :  { %95 = vsyncpa [#allocation4], 1 }
  0xf9   :  { %96 = vsyncpa [#allocation7], 1 }
  0xfa   :  { %97 = vsyncpa [#allocation5], 1 }

</bundles_post_ra>
